<compile_context>
chip_gen: v5e
topology: v5e:2x2
jax: 0.10.0
libtpu: 0.0.40
codegen_flags: <defaults>
</compile_context>

<pallas_src>
import functools

import jax
import jax.numpy as jnp
from jax.experimental import pallas as pl
from jax.experimental.pallas import tpu as pltpu


# Tile choice is driven by per-grid-step overhead (~0.35 us/step) vs. VMEM:
# a 1024-row tile is < ~2 MB of activations + outputs (double-buffered), far
# under the 32 MiB scoped default on every generation (and v7x's 64 MiB
# physical VMEM), while cutting grid steps 4-8x vs. a 256-row tile.
# Sweep 512 / 1024 / 2048 if tuning on real traffic.
MAX_TILE_B = 1024


def _round_up(x, m):
    return (x + m - 1) // m * m


def _choose_tile_b(bp):
    """Pick the largest tile (<= MAX_TILE_B) that divides bp (a multiple of 8),
    preferring >= 2 grid steps so both TensorCores on v7x get sharded work."""
    candidates = [t for t in (2048, 1024, 512, 256, 128, 64, 32, 16, 8)
                  if t <= MAX_TILE_B and bp % t == 0]
    for t in candidates:
        if bp // t >= 2:
            return t
    return candidates[0] if candidates else bp


def vaer_kernel(
    # tiled activation inputs
    x_ref, eps_ref,
    # resident weights (encoder, fused heads, decoder) + packed biases
    w1, w2, w3, wh, wd1, wd2, wd3, bpack,
    # single lane-dense output slab
    out_ref,
    *, input_size, intermediate_size, latent_dim,
):
    L = latent_dim
    I = intermediate_size

    x = x_ref[...]
    bp = bpack[...]                       # (7, Wb) resident bias pack

    b1 = bp[0:1, :2 * I]
    b2 = bp[1:2, :I]
    b3 = bp[2:3, :L]
    bh = bp[3:4, :2 * L + 2]
    bd1 = bp[4:5, :I]
    bd2 = bp[5:6, :2 * I]
    bd3 = bp[6:7, :input_size]

    def lin(h, w, b):
        return jnp.dot(h, w[...], preferred_element_type=jnp.float32) + b

    # --- encoder ---
    h = jnp.tanh(lin(x, w1, b1))
    # TODO(synk): dropout_p=0.25 skipped (eval-mode identity)
    h = jnp.tanh(lin(h, w2, b2))
    h = jnp.tanh(lin(h, w3, b3))

    # --- fused heads: one MXU push, columns = [z_mu | z_logvar | r_mu | r_logvar]
    heads = lin(h, wh, bh)                # (tile_b, 2L + 2)
    z_mu = heads[:, 0:L]
    z_lv = heads[:, L:2 * L]
    r_mu = heads[:, 2 * L:2 * L + 1]
    r_lv = heads[:, 2 * L + 1:2 * L + 2]

    # --- reparameterization: mu + eps * exp(0.5 * logvar) ---
    eps = eps_ref[...]                    # (tile_b, L + 1) = [eps_z | eps_r]
    z = z_mu + eps[:, 0:L] * jnp.exp(0.5 * z_lv)
    r = r_mu + eps[:, L:L + 1] * jnp.exp(0.5 * r_lv)

    # --- decoder ---
    d = jnp.tanh(lin(z, wd1, bd1))
    d = jnp.tanh(lin(d, wd2, bd2))
    d = jnp.tanh(lin(d, wd3, bd3))

    # --- single lane-dense output slab, filled with direct slice stores:
    #     [ x_hat | heads(2L+2) | z(L) | r(1) | pad ]
    # Pad lanes are intentionally left unwritten (stale VMEM in the writeback);
    # the wrapper never reads them.
    off = input_size
    out_ref[:, 0:input_size] = d
    out_ref[:, off:off + 2 * L + 2] = heads
    out_ref[:, off + 2 * L + 2:off + 3 * L + 2] = z
    out_ref[:, off + 3 * L + 2:off + 3 * L + 3] = r


def make_params(key, input_size, intermediate_size=64, latent_dim=8):
    """Deterministic synthetic parameters, stored as (W [in,out], b [1,out])."""
    sizes = {
        "w1": (input_size, 2 * intermediate_size),
        "w2": (2 * intermediate_size, intermediate_size),
        "w3": (intermediate_size, latent_dim),
        "wrm": (latent_dim, 1),
        "wrl": (latent_dim, 1),
        "wzm": (latent_dim, latent_dim),
        "wzl": (latent_dim, latent_dim),
        "wd1": (latent_dim, intermediate_size),
        "wd2": (intermediate_size, 2 * intermediate_size),
        "wd3": (2 * intermediate_size, input_size),
    }
    params = {}
    keys = jax.random.split(key, 2 * len(sizes))
    for i, (name, (fin, fout)) in enumerate(sizes.items()):
        kw, kb = keys[2 * i], keys[2 * i + 1]
        scale = 1.0 / jnp.sqrt(jnp.float32(fin))
        params[name] = jax.random.uniform(
            kw, (fin, fout), jnp.float32, -scale, scale)
        params["b" + name[1:]] = jax.random.uniform(
            kb, (1, fout), jnp.float32, -scale, scale)
    return params


def vaer_forward(x, eps_r, eps_z, params):
    B, input_size = x.shape
    L = params["wzm"].shape[0]
    I = params["w2"].shape[1]            # intermediate_size
    I2 = params["w1"].shape[1]           # 2 * intermediate_size

    # Fused head weight/bias: [z_mu | z_logvar | r_mu | r_logvar] -> (L, 2L+2)
    wh = jnp.concatenate(
        [params["wzm"], params["wzl"], params["wrm"], params["wrl"]], axis=1)
    bh = jnp.concatenate(
        [params["bzm"], params["bzl"], params["brm"], params["brl"]], axis=1)

    # Single eps stream: [eps_z | eps_r] -> (B, L + 1). One row-tiled DMA
    # instead of a (tile_b, 1) sublane-only stream + a (tile_b, L) stream.
    eps = jnp.concatenate([eps_z, eps_r], axis=1)

    # Pack all 7 biases into one resident (7, Wb) array (fewer DMA streams);
    # each row i holds bias i zero-padded to Wb lanes.
    bias_list = [params["b1"], params["b2"], params["b3"], bh,
                 params["bd1"], params["bd2"], params["bd3"]]
    Wb = _round_up(max(b.shape[1] for b in bias_list), 128)
    bpack = jnp.zeros((len(bias_list), Wb), jnp.float32)
    for i, b in enumerate(bias_list):
        bpack = bpack.at[i, :b.shape[1]].set(b[0])

    weights = [params["w1"], params["w2"], params["w3"], wh,
               params["wd1"], params["wd2"], params["wd3"]]

    # Batch tiling: only pad to a multiple of 8 (<= 7 rows), then pick a tile
    # that divides the padded batch exactly (no large wrapper-side pads).
    Bp = _round_up(B, 8)
    if Bp != B:
        pad = Bp - B
        x = jnp.pad(x, ((0, pad), (0, 0)))
        eps = jnp.pad(eps, ((0, pad), (0, 0)))
    tile_b = _choose_tile_b(Bp)
    grid = (Bp // tile_b,)

    # One lane-dense output slab: [x_hat | heads | z | r | pad] rounded to 128.
    packed_w = _round_up(input_size + 3 * L + 3, 128)

    def row_spec(width):
        return pl.BlockSpec((tile_b, width), lambda i: (i, 0))

    def const_spec(arr):
        return pl.BlockSpec(arr.shape, lambda i: (0, 0))

    in_specs = ([row_spec(input_size), row_spec(L + 1)]
                + [const_spec(w) for w in weights]
                + [const_spec(bpack)])
    out_specs = row_spec(packed_w)
    out_shape = jax.ShapeDtypeStruct((Bp, packed_w), jnp.float32)

    # Advisory cost estimate (whole call).
    mm_flops = 2 * Bp * (
        input_size * I2 + I2 * I + I * L + L * (2 * L + 2)
        + L * I + I * I2 + I2 * input_size)
    transcendentals = Bp * (I2 + I + L + (L + 1) + I + I2 + input_size)
    param_bytes = sum(int(w.size) for w in weights) * 4 + int(bpack.size) * 4
    bytes_accessed = 4 * Bp * (input_size + (L + 1) + packed_w) + param_bytes

    packed = pl.pallas_call(
        functools.partial(vaer_kernel, input_size=input_size,
                          intermediate_size=I, latent_dim=L),
        out_shape=out_shape,
        grid=grid,
        in_specs=in_specs,
        out_specs=out_specs,
        compiler_params=pltpu.CompilerParams(
            dimension_semantics=("parallel",)),
        cost_estimate=pl.CostEstimate(
            flops=mm_flops,
            transcendentals=transcendentals,
            bytes_accessed=bytes_accessed),
    )(x, eps, *weights, bpack)

    # Trim batch padding and split the slab.
    packed = packed[:B]
    off = input_size
    xhat = packed[:, 0:input_size]
    z_mu = packed[:, off:off + L]
    z_lv = packed[:, off + L:off + 2 * L]
    r_mu = packed[:, off + 2 * L:off + 2 * L + 1]
    r_lv = packed[:, off + 2 * L + 1:off + 2 * L + 2]
    z = packed[:, off + 2 * L + 2:off + 3 * L + 2]
    r = packed[:, off + 3 * L + 2:off + 3 * L + 3]
    return xhat, z_mu, z_lv, z, r_mu, r_lv, r


def vaer_reference(x, eps_r, eps_z, p):
    """Pure-JAX reference for validation."""
    def lin(h, w, b):
        return h @ w + b
    h = jnp.tanh(lin(x, p["w1"], p["b1"]))
    h = jnp.tanh(lin(h, p["w2"], p["b2"]))
    h = jnp.tanh(lin(h, p["w3"], p["b3"]))
    r_mu = lin(h, p["wrm"], p["brm"])
    r_lv = lin(h, p["wrl"], p["brl"])
    z_mu = lin(h, p["wzm"], p["bzm"])
    z_lv = lin(h, p["wzl"], p["bzl"])
    r = r_mu + eps_r * jnp.exp(0.5 * r_lv)
    z = z_mu + eps_z * jnp.exp(0.5 * z_lv)
    d = jnp.tanh(lin(z, p["wd1"], p["bd1"]))
    d = jnp.tanh(lin(d, p["wd2"], p["bd2"]))
    d = jnp.tanh(lin(d, p["wd3"], p["bd3"]))
    return d, z_mu, z_lv, z, r_mu, r_lv, r


if __name__ == "__main__":
    B, INPUT_SIZE, INTERMEDIATE, LATENT = 8, 32, 64, 8

    root = jax.random.PRNGKey(0)
    k_x, k_er, k_ez, k_p = jax.random.split(root, 4)

    x = jax.random.normal(k_x, (B, INPUT_SIZE), jnp.float32)
    eps_r = jax.random.normal(k_er, (B, 1), jnp.float32)
    eps_z = jax.random.normal(k_ez, (B, LATENT), jnp.float32)
    params = make_params(k_p, INPUT_SIZE, INTERMEDIATE, LATENT)

    outs = vaer_forward(x, eps_r, eps_z, params)
    outs = jax.block_until_ready(outs)

    refs = vaer_reference(x, eps_r, eps_z, params)
    for o, r in zip(outs, refs):
        assert o.shape == r.shape, (o.shape, r.shape)
        assert float(jnp.max(jnp.abs(o - r))) < 1e-5

    print("KERNEL_OK")
</pallas_src>

<mosaic_0001>
module attributes {stable_mosaic.version = 11 : i64} {
  func.func @vaer_kernel(%arg0: i32, %arg1: memref<8x32xf32, #tpu.memory_space<vmem>>, %arg2: memref<8x9xf32, #tpu.memory_space<vmem>>, %arg3: memref<32x128xf32, #tpu.memory_space<vmem>>, %arg4: memref<128x64xf32, #tpu.memory_space<vmem>>, %arg5: memref<64x8xf32, #tpu.memory_space<vmem>>, %arg6: memref<8x18xf32, #tpu.memory_space<vmem>>, %arg7: memref<8x64xf32, #tpu.memory_space<vmem>>, %arg8: memref<64x128xf32, #tpu.memory_space<vmem>>, %arg9: memref<128x32xf32, #tpu.memory_space<vmem>>, %arg10: memref<7x128xf32, #tpu.memory_space<vmem>>, %arg11: memref<8x128xf32, #tpu.memory_space<vmem>>) attributes {dimension_semantics = [#tpu.dimension_semantics<parallel>], iteration_bounds = array<i64: 1>, scalar_prefetch = 0 : i64, scratch_operands = 0 : i64, tpu.core_type = #tpu.core_type<tc>, window_params = [{transform_indices = @transform_0, window_bounds = array<i64: 8, 32>}, {transform_indices = @transform_1, window_bounds = array<i64: 8, 9>}, {pipeline_mode = #tpu.pipeline_mode<synchronous>, transform_indices = @transform_2, window_bounds = array<i64: 32, 128>}, {pipeline_mode = #tpu.pipeline_mode<synchronous>, transform_indices = @transform_3, window_bounds = array<i64: 128, 64>}, {pipeline_mode = #tpu.pipeline_mode<synchronous>, transform_indices = @transform_4, window_bounds = array<i64: 64, 8>}, {pipeline_mode = #tpu.pipeline_mode<synchronous>, transform_indices = @transform_5, window_bounds = array<i64: 8, 18>}, {pipeline_mode = #tpu.pipeline_mode<synchronous>, transform_indices = @transform_6, window_bounds = array<i64: 8, 64>}, {pipeline_mode = #tpu.pipeline_mode<synchronous>, transform_indices = @transform_7, window_bounds = array<i64: 64, 128>}, {pipeline_mode = #tpu.pipeline_mode<synchronous>, transform_indices = @transform_8, window_bounds = array<i64: 128, 32>}, {pipeline_mode = #tpu.pipeline_mode<synchronous>, transform_indices = @transform_9, window_bounds = array<i64: 7, 128>}, {transform_indices = @transform_10, window_bounds = array<i64: 8, 128>}]} {
    %c0 = arith.constant 0 : index
    %c0_0 = arith.constant 0 : index
    %0 = vector.load %arg1[%c0, %c0_0] : memref<8x32xf32, #tpu.memory_space<vmem>>, vector<8x32xf32>
    %c0_1 = arith.constant 0 : index
    %c0_2 = arith.constant 0 : index
    %1 = vector.load %arg10[%c0_1, %c0_2] : memref<7x128xf32, #tpu.memory_space<vmem>>, vector<7x128xf32>
    %2 = vector.extract_strided_slice %1 {offsets = [0, 0], sizes = [1, 128], strides = [1, 1]} : vector<7x128xf32> to vector<1x128xf32>
    %3 = vector.extract_strided_slice %1 {offsets = [1, 0], sizes = [1, 64], strides = [1, 1]} : vector<7x128xf32> to vector<1x64xf32>
    %4 = vector.extract_strided_slice %1 {offsets = [2, 0], sizes = [1, 8], strides = [1, 1]} : vector<7x128xf32> to vector<1x8xf32>
    %5 = vector.extract_strided_slice %1 {offsets = [3, 0], sizes = [1, 18], strides = [1, 1]} : vector<7x128xf32> to vector<1x18xf32>
    %6 = vector.extract_strided_slice %1 {offsets = [4, 0], sizes = [1, 64], strides = [1, 1]} : vector<7x128xf32> to vector<1x64xf32>
    %7 = vector.extract_strided_slice %1 {offsets = [5, 0], sizes = [1, 128], strides = [1, 1]} : vector<7x128xf32> to vector<1x128xf32>
    %8 = vector.extract_strided_slice %1 {offsets = [6, 0], sizes = [1, 32], strides = [1, 1]} : vector<7x128xf32> to vector<1x32xf32>
    %c0_3 = arith.constant 0 : index
    %c0_4 = arith.constant 0 : index
    %9 = vector.load %arg3[%c0_3, %c0_4] : memref<32x128xf32, #tpu.memory_space<vmem>>, vector<32x128xf32>
    %cst = arith.constant dense<0.000000e+00> : vector<8x128xf32>
    %10 = tpu.matmul %0, %9, %cst {dimension_numbers = #tpu.dot_dimension_numbers<[1], [0], [0], [1], [0, 0, 1, 1], [], []>} : vector<8x32xf32>, vector<32x128xf32>, vector<8x128xf32> -> vector<8x128xf32>
    %11 = vector.broadcast %2 : vector<1x128xf32> to vector<8x128xf32>
    %12 = arith.addf %10, %11 : vector<8x128xf32>
    %13 = math.tanh %12 : vector<8x128xf32>
    %c0_5 = arith.constant 0 : index
    %c0_6 = arith.constant 0 : index
    %14 = vector.load %arg4[%c0_5, %c0_6] : memref<128x64xf32, #tpu.memory_space<vmem>>, vector<128x64xf32>
    %cst_7 = arith.constant dense<0.000000e+00> : vector<8x64xf32>
    %15 = tpu.matmul %13, %14, %cst_7 {dimension_numbers = #tpu.dot_dimension_numbers<[1], [0], [0], [1], [0, 0, 1, 1], [], []>} : vector<8x128xf32>, vector<128x64xf32>, vector<8x64xf32> -> vector<8x64xf32>
    %16 = vector.broadcast %3 : vector<1x64xf32> to vector<8x64xf32>
    %17 = arith.addf %15, %16 : vector<8x64xf32>
    %18 = math.tanh %17 : vector<8x64xf32>
    %c0_8 = arith.constant 0 : index
    %c0_9 = arith.constant 0 : index
    %19 = vector.load %arg5[%c0_8, %c0_9] : memref<64x8xf32, #tpu.memory_space<vmem>>, vector<64x8xf32>
    %cst_10 = arith.constant dense<0.000000e+00> : vector<8x8xf32>
    %20 = tpu.matmul %18, %19, %cst_10 {dimension_numbers = #tpu.dot_dimension_numbers<[1], [0], [0], [1], [0, 0, 1, 1], [], []>} : vector<8x64xf32>, vector<64x8xf32>, vector<8x8xf32> -> vector<8x8xf32>
    %21 = vector.broadcast %4 : vector<1x8xf32> to vector<8x8xf32>
    %22 = arith.addf %20, %21 : vector<8x8xf32>
    %23 = math.tanh %22 : vector<8x8xf32>
    %c0_11 = arith.constant 0 : index
    %c0_12 = arith.constant 0 : index
    %24 = vector.load %arg6[%c0_11, %c0_12] : memref<8x18xf32, #tpu.memory_space<vmem>>, vector<8x18xf32>
    %cst_13 = arith.constant dense<0.000000e+00> : vector<8x18xf32>
    %25 = tpu.matmul %23, %24, %cst_13 {dimension_numbers = #tpu.dot_dimension_numbers<[1], [0], [0], [1], [0, 0, 1, 1], [], []>} : vector<8x8xf32>, vector<8x18xf32>, vector<8x18xf32> -> vector<8x18xf32>
    %26 = vector.broadcast %5 : vector<1x18xf32> to vector<8x18xf32>
    %27 = arith.addf %25, %26 : vector<8x18xf32>
    %28 = vector.extract_strided_slice %27 {offsets = [0, 0], sizes = [8, 8], strides = [1, 1]} : vector<8x18xf32> to vector<8x8xf32>
    %29 = vector.extract_strided_slice %27 {offsets = [0, 8], sizes = [8, 8], strides = [1, 1]} : vector<8x18xf32> to vector<8x8xf32>
    %30 = vector.extract_strided_slice %27 {offsets = [0, 16], sizes = [8, 1], strides = [1, 1]} : vector<8x18xf32> to vector<8x1xf32>
    %31 = vector.extract_strided_slice %27 {offsets = [0, 17], sizes = [8, 1], strides = [1, 1]} : vector<8x18xf32> to vector<8x1xf32>
    %c0_14 = arith.constant 0 : index
    %c0_15 = arith.constant 0 : index
    %32 = vector.load %arg2[%c0_14, %c0_15] : memref<8x9xf32, #tpu.memory_space<vmem>>, vector<8x9xf32>
    %33 = vector.extract_strided_slice %32 {offsets = [0, 0], sizes = [8, 8], strides = [1, 1]} : vector<8x9xf32> to vector<8x8xf32>
    %cst_16 = arith.constant 5.000000e-01 : f32
    %34 = vector.broadcast %cst_16 : f32 to vector<8x8xf32>
    %35 = arith.mulf %34, %29 : vector<8x8xf32>
    %36 = math.exp %35 : vector<8x8xf32>
    %37 = arith.mulf %33, %36 : vector<8x8xf32>
    %38 = arith.addf %28, %37 : vector<8x8xf32>
    %39 = vector.extract_strided_slice %32 {offsets = [0, 8], sizes = [8, 1], strides = [1, 1]} : vector<8x9xf32> to vector<8x1xf32>
    %cst_17 = arith.constant 5.000000e-01 : f32
    %40 = vector.broadcast %cst_17 : f32 to vector<8x1xf32>
    %41 = arith.mulf %40, %31 : vector<8x1xf32>
    %42 = math.exp %41 : vector<8x1xf32>
    %43 = arith.mulf %39, %42 : vector<8x1xf32>
    %44 = arith.addf %30, %43 : vector<8x1xf32>
    %c0_18 = arith.constant 0 : index
    %c0_19 = arith.constant 0 : index
    %45 = vector.load %arg7[%c0_18, %c0_19] : memref<8x64xf32, #tpu.memory_space<vmem>>, vector<8x64xf32>
    %cst_20 = arith.constant dense<0.000000e+00> : vector<8x64xf32>
    %46 = tpu.matmul %38, %45, %cst_20 {dimension_numbers = #tpu.dot_dimension_numbers<[1], [0], [0], [1], [0, 0, 1, 1], [], []>} : vector<8x8xf32>, vector<8x64xf32>, vector<8x64xf32> -> vector<8x64xf32>
    %47 = vector.broadcast %6 : vector<1x64xf32> to vector<8x64xf32>
    %48 = arith.addf %46, %47 : vector<8x64xf32>
    %49 = math.tanh %48 : vector<8x64xf32>
    %c0_21 = arith.constant 0 : index
    %c0_22 = arith.constant 0 : index
    %50 = vector.load %arg8[%c0_21, %c0_22] : memref<64x128xf32, #tpu.memory_space<vmem>>, vector<64x128xf32>
    %cst_23 = arith.constant dense<0.000000e+00> : vector<8x128xf32>
    %51 = tpu.matmul %49, %50, %cst_23 {dimension_numbers = #tpu.dot_dimension_numbers<[1], [0], [0], [1], [0, 0, 1, 1], [], []>} : vector<8x64xf32>, vector<64x128xf32>, vector<8x128xf32> -> vector<8x128xf32>
    %52 = vector.broadcast %7 : vector<1x128xf32> to vector<8x128xf32>
    %53 = arith.addf %51, %52 : vector<8x128xf32>
    %54 = math.tanh %53 : vector<8x128xf32>
    %c0_24 = arith.constant 0 : index
    %c0_25 = arith.constant 0 : index
    %55 = vector.load %arg9[%c0_24, %c0_25] : memref<128x32xf32, #tpu.memory_space<vmem>>, vector<128x32xf32>
    %cst_26 = arith.constant dense<0.000000e+00> : vector<8x32xf32>
    %56 = tpu.matmul %54, %55, %cst_26 {dimension_numbers = #tpu.dot_dimension_numbers<[1], [0], [0], [1], [0, 0, 1, 1], [], []>} : vector<8x128xf32>, vector<128x32xf32>, vector<8x32xf32> -> vector<8x32xf32>
    %57 = vector.broadcast %8 : vector<1x32xf32> to vector<8x32xf32>
    %58 = arith.addf %56, %57 : vector<8x32xf32>
    %59 = math.tanh %58 : vector<8x32xf32>
    %c0_27 = arith.constant 0 : index
    %c0_28 = arith.constant 0 : index
    %60 = vector.load %arg11[%c0_27, %c0_28] : memref<8x128xf32, #tpu.memory_space<vmem>>, vector<8x32xf32>
    tpu.vector_store %arg11[%c0_27, %c0_28], %59 {strides = array<i32>} : memref<8x128xf32, #tpu.memory_space<vmem>>, vector<8x32xf32>,
    %c0_29 = arith.constant 0 : index
    %c32 = arith.constant 32 : index
    %61 = vector.load %arg11[%c0_29, %c32] : memref<8x128xf32, #tpu.memory_space<vmem>>, vector<8x18xf32>
    tpu.vector_store %arg11[%c0_29, %c32], %27 {strides = array<i32>} : memref<8x128xf32, #tpu.memory_space<vmem>>, vector<8x18xf32>,
    %c0_30 = arith.constant 0 : index
    %c50 = arith.constant 50 : index
    %62 = vector.load %arg11[%c0_30, %c50] : memref<8x128xf32, #tpu.memory_space<vmem>>, vector<8x8xf32>
    tpu.vector_store %arg11[%c0_30, %c50], %38 {strides = array<i32>} : memref<8x128xf32, #tpu.memory_space<vmem>>, vector<8x8xf32>,
    %c0_31 = arith.constant 0 : index
    %c58 = arith.constant 58 : index
    %63 = vector.load %arg11[%c0_31, %c58] : memref<8x128xf32, #tpu.memory_space<vmem>>, vector<8x1xf32>
    tpu.vector_store %arg11[%c0_31, %c58], %44 {strides = array<i32>} : memref<8x128xf32, #tpu.memory_space<vmem>>, vector<8x1xf32>,
    return
  }
  func.func @transform_0(%arg0: i32) -> (i32, i32) {
    %c0_i32 = arith.constant 0 : i32
    %c0_i32_0 = arith.constant 0 : i32
    return %arg0, %c0_i32 : i32, i32
  }
  func.func @transform_1(%arg0: i32) -> (i32, i32) {
    %c0_i32 = arith.constant 0 : i32
    %c0_i32_0 = arith.constant 0 : i32
    return %arg0, %c0_i32 : i32, i32
  }
  func.func @transform_2(%arg0: i32) -> (i32, i32) {
    %c0_i32 = arith.constant 0 : i32
    %c0_i32_0 = arith.constant 0 : i32
    %c0_i32_1 = arith.constant 0 : i32
    return %c0_i32, %c0_i32_0 : i32, i32
  }
  func.func @transform_3(%arg0: i32) -> (i32, i32) {
    %c0_i32 = arith.constant 0 : i32
    %c0_i32_0 = arith.constant 0 : i32
    %c0_i32_1 = arith.constant 0 : i32
    return %c0_i32, %c0_i32_0 : i32, i32
  }
  func.func @transform_4(%arg0: i32) -> (i32, i32) {
    %c0_i32 = arith.constant 0 : i32
    %c0_i32_0 = arith.constant 0 : i32
    %c0_i32_1 = arith.constant 0 : i32
    return %c0_i32, %c0_i32_0 : i32, i32
  }
  func.func @transform_5(%arg0: i32) -> (i32, i32) {
    %c0_i32 = arith.constant 0 : i32
    %c0_i32_0 = arith.constant 0 : i32
    %c0_i32_1 = arith.constant 0 : i32
    return %c0_i32, %c0_i32_0 : i32, i32
  }
  func.func @transform_6(%arg0: i32) -> (i32, i32) {
    %c0_i32 = arith.constant 0 : i32
    %c0_i32_0 = arith.constant 0 : i32
    %c0_i32_1 = arith.constant 0 : i32
    return %c0_i32, %c0_i32_0 : i32, i32
  }
  func.func @transform_7(%arg0: i32) -> (i32, i32) {
    %c0_i32 = arith.constant 0 : i32
    %c0_i32_0 = arith.constant 0 : i32
    %c0_i32_1 = arith.constant 0 : i32
    return %c0_i32, %c0_i32_0 : i32, i32
  }
  func.func @transform_8(%arg0: i32) -> (i32, i32) {
    %c0_i32 = arith.constant 0 : i32
    %c0_i32_0 = arith.constant 0 : i32
    %c0_i32_1 = arith.constant 0 : i32
    return %c0_i32, %c0_i32_0 : i32, i32
  }
  func.func @transform_9(%arg0: i32) -> (i32, i32) {
    %c0_i32 = arith.constant 0 : i32
    %c0_i32_0 = arith.constant 0 : i32
    %c0_i32_1 = arith.constant 0 : i32
    return %c0_i32, %c0_i32_0 : i32, i32
  }
  func.func @transform_10(%arg0: i32) -> (i32, i32) {
    %c0_i32 = arith.constant 0 : i32
    %c0_i32_0 = arith.constant 0 : i32
    return %arg0, %c0_i32 : i32, i32
  }
}

</mosaic_0001>

<bundles_post_ra>
// kernel: tpu_custom_call.1
= control target key start
LH: loop header
LB: loop body
LE: loop exit
PB: predicated region body
PF: predicated region fallthrough
CT: control target
= control target key end

     0   :  { %vm43_vm0 = vcmask 261120   ;;  %s619_s0 = inlined_call_operand.vmem [shape: f32[8,32], index: 0, kind: input, shape index: {}]   ;;  %s620_s1 = inlined_call_operand.vmem [shape: f32[8,9], index: 1, kind: input, shape index: {}]   ;;  %s621_s2 = inlined_call_operand.vmem [shape: f32[32,128], index: 2, kind: input, shape index: {}]   ;;  %s622_s3 = inlined_call_operand.vmem [shape: f32[128,64], index: 3, kind: input, shape index: {}]   ;;  %s623_s4 = inlined_call_operand.vmem [shape: f32[64,8], index: 4, kind: input, shape index: {}]   ;;  %s624_s5 = inlined_call_operand.vmem [shape: f32[8,18], index: 5, kind: input, shape index: {}]   ;;  %s625_s6 = inlined_call_operand.vmem [shape: f32[8,64], index: 6, kind: input, shape index: {}]   ;;  %s626_s7 = inlined_call_operand.vmem [shape: f32[64,128], index: 7, kind: input, shape index: {}]   ;;  %s627_s8 = inlined_call_operand.vmem [shape: f32[128,32], index: 8, kind: input, shape index: {}]   ;;  %s628_s9 = inlined_call_operand.vmem [shape: f32[7,128], index: 9, kind: input, shape index: {}]   ;;  %s629_s10 = inlined_call_operand.hbm [shape: f32[8,128], index: 10, kind: output, shape index: {}]  }
   0x1   :  { %v41_v0 = vld [vmem:[%s621_s2 + $0x18] sm:$0xff]  ;;  %v40_v1 = vld [vmem:[%s621_s2 + $0x10] sm:$0xff]  ;;  %v39_v3 = vld [vmem:[%s621_s2 + $0x8] sm:$0xff] }
   0x2   :  { %59 = vmatpush.msra.mxu0 %v41_v0  ;;  %v83_v2 = vld [vmem:[%s622_s3 + $0x78] sm:$0xff]  ;;  %v82_v4 = vld [vmem:[%s622_s3 + $0x70] sm:$0xff]  ;;  %v81_v5 = vld [vmem:[%s622_s3 + $0x68] sm:$0xff] }
   0x3   :  { %85 = vmatpush.msra.mxu1 %v83_v2  ;;  %v38_v6 = vld [vmem:[%s621_s2] sm:$0xff] }
   0x4   :  { %60 = vmatpush.msra.mxu0 %v40_v1  ;;  %v36_v7 = vld [vmem:[%s619_s0] sm:$0xff] }
   0x5   :  { %86 = vmatpush.msra.mxu1 %v82_v4  ;;  %v80_v8 = vld [vmem:[%s622_s3 + $0x60] sm:$0xff] }
   0x6   :  { %61 = vmatpush.msra.mxu0 %v39_v3 }
   0x7   :  { %15 = vsyncpa [#allocation3], 0  ;;  %87 = vmatpush.msra.mxu1 %v81_v5  ;;  %v79_v9 = vld [vmem:[%s622_s3 + $0x58] sm:$0xff]  ;;  %v78_v10 = vld [vmem:[%s622_s3 + $0x50] sm:$0xff]  ;;  %vm115_vm1 = vcmask 523264   ;;  %vm142_vm2 = vcmask 64512  }
   0x8   :  { %62 = vmatpush.msra.mxu0 %v38_v6  ;;  %v77_v11 = vld [vmem:[%s622_s3 + $0x48] sm:$0xff]  ;;  %v76_v12 = vld [vmem:[%s622_s3 + $0x40] sm:$0xff]  ;;  %v75_v13 = vld [vmem:[%s622_s3 + $0x38] sm:$0xff]  ;;  %s369_s30 = smov 119   ;;  %s371_s2 = smov 8   ;;  %vm287_vm3 = vcmask 408832  }
   0x9   :  { %316 = vmatmul.msk.f32.vlgmr.msra.gmra.mxu0 %vm43_vm0, %v36_v7  ;;  %88 = vmatpush.msra.mxu1 %v80_v8  ;;  %v74_v14 = vld [vmem:[%s622_s3 + $0x30] sm:$0xff]  ;;  %v73_v15 = vld [vmem:[%s622_s3 + $0x28] sm:$0xff]  ;;  %v72_v16 = vld [vmem:[%s622_s3 + $0x20] sm:$0xff]  ;;  %s372_s13 = smov 32   ;;  %s373_s26 = smov 42   ;;  %vm292_vm4 = vcmask 474512  }
   0xa   :  { %v71_v17 = vld [vmem:[%s622_s3 + $0x18] sm:$0xff]  ;;  %v70_v18 = vld [vmem:[%s622_s3 + $0x10] sm:$0xff]  ;;  %v69_v19 = vld [vmem:[%s622_s3 + $0x8] sm:$0xff]  ;;  %vm298_vm5 = vcmask 482768  }
   0xb   :  { %89 = vmatpush.msra.mxu1 %v79_v9  ;;  %v68_v20 = vld [vmem:[%s622_s3] sm:$0xff]  ;;  %v113_v21 = vld [vmem:[%s623_s4 + $0x38] sm:$0xff]  ;;  %v112_v22 = vld [vmem:[%s623_s4 + $0x30] sm:$0xff] }
   0xc   :  { %127 = vmatpush.msra.mxu2 %v113_v21  ;;  %v111_v23 = vld [vmem:[%s623_s4 + $0x28] sm:$0xff]  ;;  %v506_v24 = vld [vmem:[%s628_s9] sm:$0x7f]  ;;  %v109_v30 = vld [vmem:[%s623_s4 + $0x18] sm:$0xff] }
   0xd   :  { %90 = vmatpush.msra.mxu1 %v78_v10  ;;  %v42_v25 = vperm.slane %v506_v24, 0  ;;  %v110_v29 = vld [vmem:[%s623_s4 + $0x20] sm:$0xff]  ;;  %v108_v31 = vld [vmem:[%s623_s4 + $0x10] sm:$0xff]  ;;  %v107_v32 = vld [vmem:[%s623_s4 + $0x8] sm:$0xff]  ;;  %v84_v34 = vperm.slane %v506_v24, 1  ;;  %v114_v39 = vperm.slane %v506_v24, 2 }
   0xe   :  { %128 = vmatpush.msra.mxu2 %v112_v22  ;;  %v106_v33 = vld [vmem:[%s623_s4] sm:$0xff]  ;;  %v141_v44 = vperm.slane %v506_v24, 3  ;;  %v218_v56 = vld [vmem:[%s626_s7 + $0x38] sm:$0xff]  ;;  %v217_v57 = vld [vmem:[%s626_s7 + $0x30] sm:$0xff]  ;;  %v186_v2 = vperm.slane %v506_v24, 4  ;;  %v219_v22 = vperm.slane %v506_v24, 5 }
   0xf   :  { %91 = vmatpush.msra.mxu1 %v77_v11  ;;  %v140_v38 = vld [vmem:[%s624_s5] sm:$0xff]  ;;  %s368_s5 = smov 120   ;;  %v216_v58 = vld [vmem:[%s626_s7 + $0x28] sm:$0xff]  ;;  %v214_v60 = vld [vmem:[%s626_s7 + $0x18] sm:$0xff] }
  0x10   :  { %129 = vmatpush.msra.mxu2 %v111_v23  ;;  %v185_v43 = vld [vmem:[%s625_s6] sm:$0xff]  ;;  %s370_s6 = smov 50   ;;  %v213_v61 = vld [vmem:[%s626_s7 + $0x10] sm:$0xff]  ;;  %v212_v62 = vld [vmem:[%s626_s7 + $0x8] sm:$0xff] }
  0x11   :  { %92 = vmatpush.msra.mxu1 %v76_v12  ;;  %205 = vmatpush.msrb.mxu0 %v185_v43  ;;  %v166_v50 = vld [vmem:[%s620_s1] sm:$0xff]  ;;  %v259_v6 = vld [vmem:[%s627_s8 + $0x78] sm:$0xff]  ;;  %v258_v7 = vld [vmem:[%s627_s8 + $0x70] sm:$0xff] }
  0x12   :  { %130 = vmatpush.msra.mxu2 %v110_v29  ;;  %v215_v59 = vld [vmem:[%s626_s7 + $0x20] sm:$0xff]  ;;  %261 = vmatpush.msra.mxu3 %v259_v6  ;;  %v257_v8 = vld [vmem:[%s627_s8 + $0x68] sm:$0xff]  ;;  %v255_v10 = vld [vmem:[%s627_s8 + $0x58] sm:$0xff] }
  0x13   :  { %93 = vmatpush.msra.mxu1 %v75_v13  ;;  %231 = vmatpush.msra.mxu0 %v218_v56  ;;  %v211_v63 = vld [vmem:[%s626_s7] sm:$0xff]  ;;  %v254_v11 = vld [vmem:[%s627_s8 + $0x50] sm:$0xff]  ;;  %v253_v12 = vld [vmem:[%s627_s8 + $0x48] sm:$0xff]  ;;  %s374_s7 = smov [#allocation2]  }
  0x14   :  { %131 = vmatpush.msra.mxu2 %v109_v30  ;;  %262 = vmatpush.msra.mxu3 %v258_v7  ;;  %v256_v9 = vld [vmem:[%s627_s8 + $0x60] sm:$0xff]  ;;  %s305_s29 = sshll.u32 %s374_s7, 4  ;;  %s306_s29 = int_to_ptr.vmem [resolvable:$true] %s305_s29 }
  0x15   :  { %94 = vmatpush.msra.mxu1 %v74_v14  ;;  %232 = vmatpush.msra.mxu0 %v217_v57  ;;  %v252_v13 = vld [vmem:[%s627_s8 + $0x40] sm:$0xff]  ;;  %v251_v14 = vld [vmem:[%s627_s8 + $0x38] sm:$0xff] }
  0x16   :  { %132 = vmatpush.msra.mxu2 %v108_v31  ;;  %263 = vmatpush.msra.mxu3 %v257_v8  ;;  %v244_v21 = vld [vmem:[%s627_s8] sm:$0xff] }
  0x17   :  { %95 = vmatpush.msra.mxu1 %v73_v15  ;;  %233 = vmatpush.msra.mxu0 %v216_v58  ;;  %v250_v15 = vld [vmem:[%s627_s8 + $0x30] sm:$0xff] }
  0x18   :  { %133 = vmatpush.msra.mxu2 %v107_v32  ;;  %264 = vmatpush.msra.mxu3 %v256_v9 }
  0x19   :  { %96 = vmatpush.msra.mxu1 %v72_v16  ;;  %234 = vmatpush.msra.mxu0 %v215_v59  ;;  %v249_v16 = vld [vmem:[%s627_s8 + $0x28] sm:$0xff] }
  0x1a   :  { %134 = vmatpush.msra.mxu2 %v106_v33  ;;  %265 = vmatpush.msra.mxu3 %v255_v10 }
  0x1b   :  { %97 = vmatpush.msra.mxu1 %v71_v17  ;;  %235 = vmatpush.msra.mxu0 %v214_v60  ;;  %v248_v17 = vld [vmem:[%s627_s8 + $0x20] sm:$0xff] }
  0x1c   :  { %161 = vmatpush.msrb.mxu2 %v140_v38  ;;  %266 = vmatpush.msra.mxu3 %v254_v11 }
  0x1d   :  { %98 = vmatpush.msra.mxu1 %v70_v18  ;;  %236 = vmatpush.msra.mxu0 %v213_v61  ;;  %v247_v18 = vld [vmem:[%s627_s8 + $0x18] sm:$0xff] }
  0x1e   :  { %267 = vmatpush.msra.mxu3 %v253_v12 }
  0x1f   :  { %99 = vmatpush.msra.mxu1 %v69_v19  ;;  %237 = vmatpush.msra.mxu0 %v212_v62  ;;  %v246_v19 = vld [vmem:[%s627_s8 + $0x10] sm:$0xff] }
  0x20   :  { %268 = vmatpush.msra.mxu3 %v252_v13 }
  0x21   :  { %100 = vmatpush.msra.mxu1 %v68_v20  ;;  %238 = vmatpush.msra.mxu0 %v211_v63  ;;  %v245_v20 = vld [vmem:[%s627_s8 + $0x8] sm:$0xff] }
  0x22   :  { %269 = vmatpush.msra.mxu3 %v251_v14 }
  0x24   :  { %270 = vmatpush.msra.mxu3 %v250_v15 }
  0x26   :  { %271 = vmatpush.msra.mxu3 %v249_v16 }
  0x28   :  { %272 = vmatpush.msra.mxu3 %v248_v17 }
  0x2a   :  { %273 = vmatpush.msra.mxu3 %v247_v18 }
  0x2c   :  { %274 = vmatpush.msra.mxu3 %v246_v19 }
  0x2e   :  { %275 = vmatpush.msra.mxu3 %v245_v20 }
  0x30   :  { %276 = vmatpush.msra.mxu3 %v244_v21 }
  0x86   :  { %v64_v26 = vpop.f32.mrf.mxu0 }
  0x87   :  { %v65_v27 = vadd.f32 %v64_v26, %v42_v25 }
  0x89   :  { %328 = vtanh.f32 %v65_v27  ;;  %v260_v27 = vperm.slane %v506_v24, 6 }
  0x8f   :  { %v329_v28 = vpop.eup %328 }
  0x90   :  { %101 = vmatmul.f32.vlgmr.msra.gmra.mxu1 %v329_v28 }
 0x10d   :  { %v102_v35 = vpop.f32.mrf.mxu1 }
 0x10e   :  { %v103_v36 = vadd.f32 %v102_v35, %v84_v34 }
 0x110   :  { %330 = vtanh.f32 %v103_v36 }
 0x116   :  { %v331_v37 = vpop.eup %330 }
 0x117   :  { %317 = vmatmul.msk.f32.vlgmr.msra.gmra.mxu2 %vm115_vm1, %v331_v37 }
 0x19a   :  { %v136_v40 = vpop.f32.mrf.mxu2 }
 0x19b   :  { %v137_v41 = vadd.f32 %v136_v40, %v114_v39 }
 0x19d   :  { %332 = vtanh.f32 %v137_v41 }
 0x1a3   :  { %v333_v42 = vpop.eup %332 }
 0x1a4   :  { %318 = vmatmul.msk.f32.vlgmr.msrb.gmra.mxu2 %vm142_vm2, %v333_v42 }
 0x227   :  { %v163_v45 = vpop.f32.mrf.mxu2 }
 0x228   :  { %v164_v46 = vadd.f32 %v163_v45, %v141_v44 }
 0x22a   :  { %v167_v47 = vmul.f32 0.5, %v164_v46 }
 0x22c   :  { %v168_v48 = vmul.f32 1.442695, %v167_v47 }
 0x22e   :  { %334 = vpow2.f32 %v168_v48 }
 0x234   :  { %v335_v49 = vpop.eup %334 }
 0x235   :  { %171 = vrot.lane.b32.xlu0 %v335_v49, %s368_s5 }
 0x23d   :  { %176 = vrot.lane.b32.xlu0 %v335_v49, %s369_s30  ;;  %s307_s30 = sshll.u32 %s629_s10, 4  ;;  %s308_s30 = int_to_ptr.hbm [resolvable:$true] %s307_s30 }
 0x2a7   :  { %v172_v51 = vpop.permute.xlu0 %171 }
 0x2a8   :  { %v174_v52 = vmul.f32 %v172_v51, %v166_v50 }
 0x2aa   :  { %v175_v53 = vadd.f32 %v174_v52, %v164_v46 }
 0x2ac   :  { %289 = vrot.lane.b32.xlu2 %v175_v53, %s370_s6  ;;  %319 = vmatmul.msk.f32.vlgmr.msrb.gmra.mxu0 %vm142_vm2, %v175_v53 }
 0x2af   :  { %v177_v54 = vpop.permute.xlu0 %176 }
 0x2b0   :  { %v179_v55 = vmul.f32 %v177_v54, %v166_v50 }
 0x2b2   :  { %181 = vrot.lane.b32.xlu1 %v179_v55, %s371_s2 }
 0x2ba   :  { %284 = vrot.lane.b32.xlu1 %v164_v46, %s372_s13 }
 0x306   :  { %v290_v30 = vpop.permute.xlu2 %289 }
 0x324   :  { %v182_v0 = vpop.permute.xlu1 %181 }
 0x325   :  { %v184_v1 = vadd.f32 %v182_v0, %v164_v46 }
 0x327   :  { %295 = vrot.lane.b32.xlu2 %v184_v1, %s373_s26 }
 0x329   :  { %v207_v3 = vpop.f32.mrf.mxu0 }
 0x32a   :  { %v208_v4 = vadd.f32 %v207_v3, %v186_v2 }
 0x32c   :  { %336 = vtanh.f32 %v208_v4  ;;  %v285_v32 = vpop.permute.xlu1 %284 }
 0x332   :  { %v337_v5 = vpop.eup %336 }
 0x333   :  { %320 = vmatmul.msk.f32.vlgmr.msra.gmra.mxu0 %vm115_vm1, %v337_v5 }
 0x381   :  { %v296_v24 = vpop.permute.xlu2 %295 }
 0x3b0   :  { %v240_v23 = vpop.f32.mrf.mxu0 }
 0x3b1   :  { %v241_v25 = vadd.f32 %v240_v23, %v219_v22 }
 0x3b3   :  { %338 = vtanh.f32 %v241_v25 }
 0x3b9   :  { %v339_v26 = vpop.eup %338 }
 0x3ba   :  { %277 = vmatmul.f32.vlgmr.msra.gmra.mxu3 %v339_v26 }
 0x43d   :  { %v278_v28 = vpop.f32.mrf.mxu3 }
 0x43e   :  { %v279_v29 = vadd.f32 %v278_v28, %v260_v27 }
 0x440   :  { %340 = vtanh.f32 %v279_v29 }
 0x446   :  { %v341_v31 = vpop.eup %340 }
 0x447   :  { %282 = vst.msk [vmem:[#allocation2] sm:$0xff] %vm43_vm0, %v341_v31 }
 0x448   :  { %288 = vst.msk [vmem:[#allocation2] sm:$0xff] %vm287_vm3, %v285_v32 }
 0x449   :  { %293 = vst.msk [vmem:[#allocation2] sm:$0xff] %vm292_vm4, %v290_v30 }
 0x44a   :  { %299 = vst.msk [vmem:[#allocation2] sm:$0xff] %vm298_vm5, %v296_v24 }
 0x44b   :  { %310 = dma.vmem_to_hbm [thread:$0]  %s306_s29, 128, %s308_s30, [#allocation3]  }
 0x44c   :  { %366 = dma.done.wait [#allocation3], 128  }
 0x44d   :  { %367 = vsyncadd [#allocation3], 4294967168 }
 0x44e   :  { %315 = vsyncpa [#allocation3], 1 }

</bundles_post_ra>
